<compile_context>
chip_gen: v6e
topology: v6e:2x2x1
jax: 0.10.0
libtpu: 0.0.40
codegen_flags: <defaults>
</compile_context>

<pallas_src>
import functools

import jax
import jax.numpy as jnp
from jax.experimental import pallas as pl
from jax.experimental.pallas import tpu as pltpu


def _tile_sizes(n, block_n):
    """Lane-axis tile (multiple of 128) and padded batch length."""
    block_n = max(128, (int(block_n) // 128) * 128)      # enforce 128-lane divisibility
    n128 = pl.cdiv(n, 128) * 128
    tn = min(block_n, n128)
    # Guarantee >= 2 grid steps when there is enough work so the "parallel"
    # axis can shard across both TensorCores on v7x (neutral on v5e/v6e).
    if n128 >= 256:
        tn = min(tn, ((n128 // 2) // 128) * 128)
    n_pad = pl.cdiv(n, tn) * tn
    return tn, n_pad


def _sample_uniform(key, k, n_pad):
    # Generated directly in feature-major (K, n_pad) layout -> no wrapper transpose.
    return jax.random.uniform(key, (k, n_pad), dtype=jnp.float32,
                              minval=1e-6, maxval=1.0 - 1e-6)


def _poisson_backward_kernel(tau, transpose_out, x_ref, w1_ref, b1_ref, w2_ref,
                             b2_ref, w3_ref, b3_ref, u_ref, h_ref, z_ref):
    """Feature-major compute: x (1,TN), weights resident, u (K,TN)."""
    x = x_ref[...]                                            # (1, TN)

    # Linear(1, L): outer product + bias, ReLU.
    h1 = jnp.maximum(w1_ref[...] * x + b1_ref[...], 0.0)      # (L, TN)

    # Linear(L, L): h2^T = W2 @ h1^T + b2, ReLU.
    h2 = jnp.dot(w2_ref[...], h1,
                 preferred_element_type=jnp.float32) + b2_ref[...]
    h2 = jnp.maximum(h2, 0.0)

    # Linear(L, K): logits^T = W3 @ h2^T + b3.
    logits = jnp.dot(w3_ref[...], h2,
                     preferred_element_type=jnp.float32) + b3_ref[...]   # (K, TN)

    # LogSoftmax over K (axis 0 -> sublane reduction).
    m = jnp.max(logits, axis=0, keepdims=True)
    e = jnp.exp(logits - m)
    lse = m + jnp.log(jnp.sum(e, axis=0, keepdims=True))
    h = logits - lse                                          # (K, TN)

    # Gumbel-Softmax relaxed sample; Gumbel transform folded in-kernel.
    g = -jnp.log(-jnp.log(u_ref[...]))                        # (K, TN)
    y = (h + g) * (1.0 / tau)
    ym = jnp.max(y, axis=0, keepdims=True)
    p = jnp.exp(y - ym)
    s = jnp.sum(p, axis=0, keepdims=True)
    z = p * (1.0 / s)           # hoisted exact reciprocal: TN divides, not K*TN

    if transpose_out:
        # (K,TN) -> (TN,K) on the XLU; saves a full HBM round trip per output.
        h_ref[...] = h.T.astype(h_ref.dtype)
        z_ref[...] = z.T.astype(z_ref.dtype)
    else:
        h_ref[...] = h.astype(h_ref.dtype)
        z_ref[...] = z.astype(z_ref.dtype)


def poisson_backward_forward(x, params, key, tau, *, block_n=2048,
                             out_dtype=jnp.float32, transpose_in_kernel=True):
    """x: [N, 1, 1] f32; params: W1[L,1] b1[L] W2[L,L] b2[L] W3[K,L] b3[K];
    key: PRNG key for the categorical sampler's Gumbel noise.
    Returns (h [N,K], z [N,K])."""
    N = x.shape[0]
    L = params["W2"].shape[0]
    K = params["W3"].shape[0]
    tn, n_pad = _tile_sizes(N, block_n)

    xT = x.reshape(N).astype(jnp.float32)[None, :]            # (1, N)
    if n_pad != N:
        xT = jnp.pad(xT, ((0, 0), (0, n_pad - N)))            # padded cols discarded
    u = _sample_uniform(key, K, n_pad)                        # (K, n_pad), feature-major

    w1 = params["W1"].reshape(L, 1).astype(jnp.float32)
    b1 = params["b1"].reshape(L, 1).astype(jnp.float32)
    w2 = params["W2"].astype(jnp.float32)
    b2 = params["b2"].reshape(L, 1).astype(jnp.float32)
    w3 = params["W3"].astype(jnp.float32)
    b3 = params["b3"].reshape(K, 1).astype(jnp.float32)

    grid = (n_pad // tn,)
    const = lambda i: (0, 0)          # weights: fetched once, stay resident
    tile = lambda i: (0, i)           # batch-streamed tensors (lane axis)

    in_specs = [
        pl.BlockSpec((1, tn), tile),    # x^T
        pl.BlockSpec((L, 1), const),    # W1
        pl.BlockSpec((L, 1), const),    # b1
        pl.BlockSpec((L, L), const),    # W2
        pl.BlockSpec((L, 1), const),    # b2
        pl.BlockSpec((K, L), const),    # W3
        pl.BlockSpec((K, 1), const),    # b3
        pl.BlockSpec((K, tn), tile),    # uniform noise (feature-major)
        # NOTE: pipeline_mode=pl.Buffered(3) on the streamed specs is a
        # possible further tweak if profiling shows exposed DMA.
    ]
    args = (xT, w1, b1, w2, b2, w3, b3, u)
    cparams = pltpu.CompilerParams(dimension_semantics=("parallel",))

    def run(transpose_out):
        if transpose_out:
            out_shape = (jax.ShapeDtypeStruct((n_pad, K), out_dtype),
                         jax.ShapeDtypeStruct((n_pad, K), out_dtype))
            out_specs = (pl.BlockSpec((tn, K), lambda i: (i, 0)),
                         pl.BlockSpec((tn, K), lambda i: (i, 0)))
        else:
            out_shape = (jax.ShapeDtypeStruct((K, n_pad), out_dtype),
                         jax.ShapeDtypeStruct((K, n_pad), out_dtype))
            out_specs = (pl.BlockSpec((K, tn), tile),
                         pl.BlockSpec((K, tn), tile))
        return pl.pallas_call(
            functools.partial(_poisson_backward_kernel, float(tau), transpose_out),
            out_shape=out_shape, grid=grid,
            in_specs=in_specs, out_specs=out_specs,
            compiler_params=cparams,
        )(*args)

    if transpose_in_kernel:
        try:
            h, z = jax.block_until_ready(run(True))
            return h[:N], z[:N]
        except Exception:
            # Fallback: if this toolchain rejects the in-kernel (K,TN)->(TN,K)
            # transpose, keep lane-dense outputs and transpose in the wrapper.
            pass
    hT, zT = run(False)
    return hT[:, :N].T, zT[:, :N].T


if __name__ == "__main__":
    # Module hyperparameters: K latent categories, L = hidden size = batch
    # length (the module's docstring says the input is [L, 1, 1]).
    K, L, tau = 32, 8, 0.5

    key = jax.random.PRNGKey(0)
    k1, k2, k3, k4, k5, k6, kx, kg = jax.random.split(key, 8)
    s = 0.1
    params = {
        "W1": s * jax.random.normal(k1, (L, 1), dtype=jnp.float32),
        "b1": s * jax.random.normal(k2, (L,), dtype=jnp.float32),
        "W2": s * jax.random.normal(k3, (L, L), dtype=jnp.float32),
        "b2": s * jax.random.normal(k4, (L,), dtype=jnp.float32),
        "W3": s * jax.random.normal(k5, (K, L), dtype=jnp.float32),
        "b3": s * jax.random.normal(k6, (K,), dtype=jnp.float32),
    }
    x = jax.random.normal(kx, (L, 1, 1), dtype=jnp.float32)

    h, z = poisson_backward_forward(x, params, kg, tau)
    h, z = jax.block_until_ready((h, z))

    # Pure-JAX reference of the same forward pass (same noise stream).
    _, n_pad = _tile_sizes(L, 2048)
    u = _sample_uniform(kg, K, n_pad)[:, :L]                  # (K, L)
    gumbel = (-jnp.log(-jnp.log(u))).T                        # (L, K)

    hp = jax.lax.Precision.HIGHEST
    xs = x.reshape(L, 1)
    h1 = jnp.maximum(jnp.dot(xs, params["W1"].T, precision=hp) + params["b1"], 0.0)
    h2 = jnp.maximum(jnp.dot(h1, params["W2"].T, precision=hp) + params["b2"], 0.0)
    logits = jnp.dot(h2, params["W3"].T, precision=hp) + params["b3"]
    h_ref = jax.nn.log_softmax(logits, axis=-1)
    z_ref = jax.nn.softmax((h_ref + gumbel) / tau, axis=-1)

    assert h.shape == (L, K) and z.shape == (L, K)
    assert jnp.allclose(h, h_ref, rtol=2e-5, atol=2e-5)
    assert jnp.allclose(z, z_ref, rtol=2e-5, atol=2e-5)
    assert bool(jnp.all(jnp.isfinite(h))) and bool(jnp.all(jnp.isfinite(z)))

    print("KERNEL_OK")
</pallas_src>

<mosaic_0001>
module attributes {stable_mosaic.version = 11 : i64} {
  func.func @_poisson_backward_kernel(%arg0: i32, %arg1: memref<1x128xf32, #tpu.memory_space<vmem>>, %arg2: memref<8x1xf32, #tpu.memory_space<vmem>>, %arg3: memref<8x1xf32, #tpu.memory_space<vmem>>, %arg4: memref<8x8xf32, #tpu.memory_space<vmem>>, %arg5: memref<8x1xf32, #tpu.memory_space<vmem>>, %arg6: memref<32x8xf32, #tpu.memory_space<vmem>>, %arg7: memref<32x1xf32, #tpu.memory_space<vmem>>, %arg8: memref<32x128xf32, #tpu.memory_space<vmem>>, %arg9: memref<128x32xf32, #tpu.memory_space<vmem>>, %arg10: memref<128x32xf32, #tpu.memory_space<vmem>>) attributes {dimension_semantics = [#tpu.dimension_semantics<parallel>], iteration_bounds = array<i64: 1>, scalar_prefetch = 0 : i64, scratch_operands = 0 : i64, tpu.core_type = #tpu.core_type<tc>, window_params = [{transform_indices = @transform_0, window_bounds = array<i64: 1, 128>}, {pipeline_mode = #tpu.pipeline_mode<synchronous>, transform_indices = @transform_1, window_bounds = array<i64: 8, 1>}, {pipeline_mode = #tpu.pipeline_mode<synchronous>, transform_indices = @transform_2, window_bounds = array<i64: 8, 1>}, {pipeline_mode = #tpu.pipeline_mode<synchronous>, transform_indices = @transform_3, window_bounds = array<i64: 8, 8>}, {pipeline_mode = #tpu.pipeline_mode<synchronous>, transform_indices = @transform_4, window_bounds = array<i64: 8, 1>}, {pipeline_mode = #tpu.pipeline_mode<synchronous>, transform_indices = @transform_5, window_bounds = array<i64: 32, 8>}, {pipeline_mode = #tpu.pipeline_mode<synchronous>, transform_indices = @transform_6, window_bounds = array<i64: 32, 1>}, {transform_indices = @transform_7, window_bounds = array<i64: 32, 128>}, {transform_indices = @transform_8, window_bounds = array<i64: 128, 32>}, {transform_indices = @transform_9, window_bounds = array<i64: 128, 32>}]} {
    %c0 = arith.constant 0 : index
    %c0_0 = arith.constant 0 : index
    %0 = vector.load %arg1[%c0, %c0_0] : memref<1x128xf32, #tpu.memory_space<vmem>>, vector<1x128xf32>
    %c0_1 = arith.constant 0 : index
    %c0_2 = arith.constant 0 : index
    %1 = vector.load %arg2[%c0_1, %c0_2] : memref<8x1xf32, #tpu.memory_space<vmem>>, vector<8x1xf32>
    %2 = vector.broadcast %1 : vector<8x1xf32> to vector<8x128xf32>
    %3 = vector.broadcast %0 : vector<1x128xf32> to vector<8x128xf32>
    %4 = arith.mulf %2, %3 : vector<8x128xf32>
    %c0_3 = arith.constant 0 : index
    %c0_4 = arith.constant 0 : index
    %5 = vector.load %arg3[%c0_3, %c0_4] : memref<8x1xf32, #tpu.memory_space<vmem>>, vector<8x1xf32>
    %6 = vector.broadcast %5 : vector<8x1xf32> to vector<8x128xf32>
    %7 = arith.addf %4, %6 : vector<8x128xf32>
    %cst = arith.constant 0.000000e+00 : f32
    %8 = vector.broadcast %cst : f32 to vector<8x128xf32>
    %9 = arith.maximumf %7, %8 : vector<8x128xf32>
    %c0_5 = arith.constant 0 : index
    %c0_6 = arith.constant 0 : index
    %10 = vector.load %arg4[%c0_5, %c0_6] : memref<8x8xf32, #tpu.memory_space<vmem>>, vector<8x8xf32>
    %cst_7 = arith.constant dense<0.000000e+00> : vector<8x128xf32>
    %11 = tpu.matmul %10, %9, %cst_7 {dimension_numbers = #tpu.dot_dimension_numbers<[1], [0], [0], [1], [0, 0, 1, 1], [], []>} : vector<8x8xf32>, vector<8x128xf32>, vector<8x128xf32> -> vector<8x128xf32>
    %c0_8 = arith.constant 0 : index
    %c0_9 = arith.constant 0 : index
    %12 = vector.load %arg5[%c0_8, %c0_9] : memref<8x1xf32, #tpu.memory_space<vmem>>, vector<8x1xf32>
    %13 = vector.broadcast %12 : vector<8x1xf32> to vector<8x128xf32>
    %14 = arith.addf %11, %13 : vector<8x128xf32>
    %cst_10 = arith.constant 0.000000e+00 : f32
    %15 = vector.broadcast %cst_10 : f32 to vector<8x128xf32>
    %16 = arith.maximumf %14, %15 : vector<8x128xf32>
    %c0_11 = arith.constant 0 : index
    %c0_12 = arith.constant 0 : index
    %17 = vector.load %arg6[%c0_11, %c0_12] : memref<32x8xf32, #tpu.memory_space<vmem>>, vector<32x8xf32>
    %cst_13 = arith.constant dense<0.000000e+00> : vector<32x128xf32>
    %18 = tpu.matmul %17, %16, %cst_13 {dimension_numbers = #tpu.dot_dimension_numbers<[1], [0], [0], [1], [0, 0, 1, 1], [], []>} : vector<32x8xf32>, vector<8x128xf32>, vector<32x128xf32> -> vector<32x128xf32>
    %c0_14 = arith.constant 0 : index
    %c0_15 = arith.constant 0 : index
    %19 = vector.load %arg7[%c0_14, %c0_15] : memref<32x1xf32, #tpu.memory_space<vmem>>, vector<32x1xf32>
    %20 = vector.broadcast %19 : vector<32x1xf32> to vector<32x128xf32>
    %21 = arith.addf %18, %20 : vector<32x128xf32>
    %cst_16 = arith.constant dense<0xFF800000> : vector<128xf32>
    %22 = vector.multi_reduction <maximumf>, %21, %cst_16 [0] : vector<32x128xf32> to vector<128xf32>
    %23 = vector.shape_cast %22 : vector<128xf32> to vector<1x128xf32>
    %24 = vector.broadcast %23 : vector<1x128xf32> to vector<32x128xf32>
    %25 = arith.subf %21, %24 : vector<32x128xf32>
    %26 = math.exp %25 : vector<32x128xf32>
    %cst_17 = arith.constant dense<0.000000e+00> : vector<128xf32>
    %27 = vector.multi_reduction <add>, %26, %cst_17 [0] : vector<32x128xf32> to vector<128xf32>
    %28 = vector.shape_cast %27 : vector<128xf32> to vector<1x128xf32>
    %29 = math.log %28 : vector<1x128xf32>
    %30 = arith.addf %23, %29 : vector<1x128xf32>
    %31 = vector.broadcast %30 : vector<1x128xf32> to vector<32x128xf32>
    %32 = arith.subf %21, %31 : vector<32x128xf32>
    %c0_18 = arith.constant 0 : index
    %c0_19 = arith.constant 0 : index
    %33 = vector.load %arg8[%c0_18, %c0_19] : memref<32x128xf32, #tpu.memory_space<vmem>>, vector<32x128xf32>
    %34 = math.log %33 : vector<32x128xf32>
    %cst_20 = arith.constant 0.000000e+00 : f32
    %35 = vector.broadcast %cst_20 : f32 to vector<32x128xf32>
    %36 = arith.subf %35, %34 : vector<32x128xf32>
    %37 = math.log %36 : vector<32x128xf32>
    %cst_21 = arith.constant 0.000000e+00 : f32
    %38 = vector.broadcast %cst_21 : f32 to vector<32x128xf32>
    %39 = arith.subf %38, %37 : vector<32x128xf32>
    %40 = arith.addf %32, %39 : vector<32x128xf32>
    %cst_22 = arith.constant 2.000000e+00 : f32
    %41 = vector.broadcast %cst_22 : f32 to vector<32x128xf32>
    %42 = arith.mulf %40, %41 : vector<32x128xf32>
    %cst_23 = arith.constant dense<0xFF800000> : vector<128xf32>
    %43 = vector.multi_reduction <maximumf>, %42, %cst_23 [0] : vector<32x128xf32> to vector<128xf32>
    %44 = vector.shape_cast %43 : vector<128xf32> to vector<1x128xf32>
    %45 = vector.broadcast %44 : vector<1x128xf32> to vector<32x128xf32>
    %46 = arith.subf %42, %45 : vector<32x128xf32>
    %47 = math.exp %46 : vector<32x128xf32>
    %cst_24 = arith.constant dense<0.000000e+00> : vector<128xf32>
    %48 = vector.multi_reduction <add>, %47, %cst_24 [0] : vector<32x128xf32> to vector<128xf32>
    %49 = vector.shape_cast %48 : vector<128xf32> to vector<1x128xf32>
    %cst_25 = arith.constant 1.000000e+00 : f32
    %50 = vector.broadcast %cst_25 : f32 to vector<1x128xf32>
    %51 = arith.divf %50, %49 : vector<1x128xf32>
    %52 = vector.broadcast %51 : vector<1x128xf32> to vector<32x128xf32>
    %53 = arith.mulf %47, %52 : vector<32x128xf32>
    %54 = tpu.transpose %32, [1, 0] : vector<32x128xf32> -> vector<128x32xf32>
    %c0_26 = arith.constant 0 : index
    %c0_27 = arith.constant 0 : index
    %55 = vector.load %arg9[%c0_26, %c0_27] : memref<128x32xf32, #tpu.memory_space<vmem>>, vector<128x32xf32>
    tpu.vector_store %arg9[%c0_26, %c0_27], %54 {strides = array<i32>} : memref<128x32xf32, #tpu.memory_space<vmem>>, vector<128x32xf32>,
    %56 = tpu.transpose %53, [1, 0] : vector<32x128xf32> -> vector<128x32xf32>
    %c0_28 = arith.constant 0 : index
    %c0_29 = arith.constant 0 : index
    %57 = vector.load %arg10[%c0_28, %c0_29] : memref<128x32xf32, #tpu.memory_space<vmem>>, vector<128x32xf32>
    tpu.vector_store %arg10[%c0_28, %c0_29], %56 {strides = array<i32>} : memref<128x32xf32, #tpu.memory_space<vmem>>, vector<128x32xf32>,
    return
  }
  func.func @transform_0(%arg0: i32) -> (i32, i32) {
    %c0_i32 = arith.constant 0 : i32
    %c0_i32_0 = arith.constant 0 : i32
    return %c0_i32, %arg0 : i32, i32
  }
  func.func @transform_1(%arg0: i32) -> (i32, i32) {
    %c0_i32 = arith.constant 0 : i32
    %c0_i32_0 = arith.constant 0 : i32
    %c0_i32_1 = arith.constant 0 : i32
    return %c0_i32, %c0_i32_0 : i32, i32
  }
  func.func @transform_2(%arg0: i32) -> (i32, i32) {
    %c0_i32 = arith.constant 0 : i32
    %c0_i32_0 = arith.constant 0 : i32
    %c0_i32_1 = arith.constant 0 : i32
    return %c0_i32, %c0_i32_0 : i32, i32
  }
  func.func @transform_3(%arg0: i32) -> (i32, i32) {
    %c0_i32 = arith.constant 0 : i32
    %c0_i32_0 = arith.constant 0 : i32
    %c0_i32_1 = arith.constant 0 : i32
    return %c0_i32, %c0_i32_0 : i32, i32
  }
  func.func @transform_4(%arg0: i32) -> (i32, i32) {
    %c0_i32 = arith.constant 0 : i32
    %c0_i32_0 = arith.constant 0 : i32
    %c0_i32_1 = arith.constant 0 : i32
    return %c0_i32, %c0_i32_0 : i32, i32
  }
  func.func @transform_5(%arg0: i32) -> (i32, i32) {
    %c0_i32 = arith.constant 0 : i32
    %c0_i32_0 = arith.constant 0 : i32
    %c0_i32_1 = arith.constant 0 : i32
    return %c0_i32, %c0_i32_0 : i32, i32
  }
  func.func @transform_6(%arg0: i32) -> (i32, i32) {
    %c0_i32 = arith.constant 0 : i32
    %c0_i32_0 = arith.constant 0 : i32
    %c0_i32_1 = arith.constant 0 : i32
    return %c0_i32, %c0_i32_0 : i32, i32
  }
  func.func @transform_7(%arg0: i32) -> (i32, i32) {
    %c0_i32 = arith.constant 0 : i32
    %c0_i32_0 = arith.constant 0 : i32
    return %c0_i32, %arg0 : i32, i32
  }
  func.func @transform_8(%arg0: i32) -> (i32, i32) {
    %c0_i32 = arith.constant 0 : i32
    %c0_i32_0 = arith.constant 0 : i32
    return %arg0, %c0_i32 : i32, i32
  }
  func.func @transform_9(%arg0: i32) -> (i32, i32) {
    %c0_i32 = arith.constant 0 : i32
    %c0_i32_0 = arith.constant 0 : i32
    return %arg0, %c0_i32 : i32, i32
  }
}

module attributes {stable_mosaic.version = 11 : i64} {
  func.func @_poisson_backward_kernel(%arg0: i32, %arg1: memref<1x128xf32, #tpu.memory_space<vmem>>, %arg2: memref<8x1xf32, #tpu.memory_space<vmem>>, %arg3: memref<8x1xf32, #tpu.memory_space<vmem>>, %arg4: memref<8x8xf32, #tpu.memory_space<vmem>>, %arg5: memref<8x1xf32, #tpu.memory_space<vmem>>, %arg6: memref<32x8xf32, #tpu.memory_space<vmem>>, %arg7: memref<32x1xf32, #tpu.memory_space<vmem>>, %arg8: memref<32x128xf32, #tpu.memory_space<vmem>>, %arg9: memref<32x128xf32, #tpu.memory_space<vmem>>, %arg10: memref<32x128xf32, #tpu.memory_space<vmem>>) attributes {dimension_semantics = [#tpu.dimension_semantics<parallel>], iteration_bounds = array<i64: 1>, scalar_prefetch = 0 : i64, scratch_operands = 0 : i64, tpu.core_type = #tpu.core_type<tc>, window_params = [{transform_indices = @transform_0, window_bounds = array<i64: 1, 128>}, {pipeline_mode = #tpu.pipeline_mode<synchronous>, transform_indices = @transform_1, window_bounds = array<i64: 8, 1>}, {pipeline_mode = #tpu.pipeline_mode<synchronous>, transform_indices = @transform_2, window_bounds = array<i64: 8, 1>}, {pipeline_mode = #tpu.pipeline_mode<synchronous>, transform_indices = @transform_3, window_bounds = array<i64: 8, 8>}, {pipeline_mode = #tpu.pipeline_mode<synchronous>, transform_indices = @transform_4, window_bounds = array<i64: 8, 1>}, {pipeline_mode = #tpu.pipeline_mode<synchronous>, transform_indices = @transform_5, window_bounds = array<i64: 32, 8>}, {pipeline_mode = #tpu.pipeline_mode<synchronous>, transform_indices = @transform_6, window_bounds = array<i64: 32, 1>}, {transform_indices = @transform_7, window_bounds = array<i64: 32, 128>}, {transform_indices = @transform_8, window_bounds = array<i64: 32, 128>}, {transform_indices = @transform_9, window_bounds = array<i64: 32, 128>}]} {
    %c0 = arith.constant 0 : index
    %c0_0 = arith.constant 0 : index
    %0 = vector.load %arg1[%c0, %c0_0] : memref<1x128xf32, #tpu.memory_space<vmem>>, vector<1x128xf32>
    %c0_1 = arith.constant 0 : index
    %c0_2 = arith.constant 0 : index
    %1 = vector.load %arg2[%c0_1, %c0_2] : memref<8x1xf32, #tpu.memory_space<vmem>>, vector<8x1xf32>
    %2 = vector.broadcast %1 : vector<8x1xf32> to vector<8x128xf32>
    %3 = vector.broadcast %0 : vector<1x128xf32> to vector<8x128xf32>
    %4 = arith.mulf %2, %3 : vector<8x128xf32>
    %c0_3 = arith.constant 0 : index
    %c0_4 = arith.constant 0 : index
    %5 = vector.load %arg3[%c0_3, %c0_4] : memref<8x1xf32, #tpu.memory_space<vmem>>, vector<8x1xf32>
    %6 = vector.broadcast %5 : vector<8x1xf32> to vector<8x128xf32>
    %7 = arith.addf %4, %6 : vector<8x128xf32>
    %cst = arith.constant 0.000000e+00 : f32
    %8 = vector.broadcast %cst : f32 to vector<8x128xf32>
    %9 = arith.maximumf %7, %8 : vector<8x128xf32>
    %c0_5 = arith.constant 0 : index
    %c0_6 = arith.constant 0 : index
    %10 = vector.load %arg4[%c0_5, %c0_6] : memref<8x8xf32, #tpu.memory_space<vmem>>, vector<8x8xf32>
    %cst_7 = arith.constant dense<0.000000e+00> : vector<8x128xf32>
    %11 = tpu.matmul %10, %9, %cst_7 {dimension_numbers = #tpu.dot_dimension_numbers<[1], [0], [0], [1], [0, 0, 1, 1], [], []>} : vector<8x8xf32>, vector<8x128xf32>, vector<8x128xf32> -> vector<8x128xf32>
    %c0_8 = arith.constant 0 : index
    %c0_9 = arith.constant 0 : index
    %12 = vector.load %arg5[%c0_8, %c0_9] : memref<8x1xf32, #tpu.memory_space<vmem>>, vector<8x1xf32>
    %13 = vector.broadcast %12 : vector<8x1xf32> to vector<8x128xf32>
    %14 = arith.addf %11, %13 : vector<8x128xf32>
    %cst_10 = arith.constant 0.000000e+00 : f32
    %15 = vector.broadcast %cst_10 : f32 to vector<8x128xf32>
    %16 = arith.maximumf %14, %15 : vector<8x128xf32>
    %c0_11 = arith.constant 0 : index
    %c0_12 = arith.constant 0 : index
    %17 = vector.load %arg6[%c0_11, %c0_12] : memref<32x8xf32, #tpu.memory_space<vmem>>, vector<32x8xf32>
    %cst_13 = arith.constant dense<0.000000e+00> : vector<32x128xf32>
    %18 = tpu.matmul %17, %16, %cst_13 {dimension_numbers = #tpu.dot_dimension_numbers<[1], [0], [0], [1], [0, 0, 1, 1], [], []>} : vector<32x8xf32>, vector<8x128xf32>, vector<32x128xf32> -> vector<32x128xf32>
    %c0_14 = arith.constant 0 : index
    %c0_15 = arith.constant 0 : index
    %19 = vector.load %arg7[%c0_14, %c0_15] : memref<32x1xf32, #tpu.memory_space<vmem>>, vector<32x1xf32>
    %20 = vector.broadcast %19 : vector<32x1xf32> to vector<32x128xf32>
    %21 = arith.addf %18, %20 : vector<32x128xf32>
    %cst_16 = arith.constant dense<0xFF800000> : vector<128xf32>
    %22 = vector.multi_reduction <maximumf>, %21, %cst_16 [0] : vector<32x128xf32> to vector<128xf32>
    %23 = vector.shape_cast %22 : vector<128xf32> to vector<1x128xf32>
    %24 = vector.broadcast %23 : vector<1x128xf32> to vector<32x128xf32>
    %25 = arith.subf %21, %24 : vector<32x128xf32>
    %26 = math.exp %25 : vector<32x128xf32>
    %cst_17 = arith.constant dense<0.000000e+00> : vector<128xf32>
    %27 = vector.multi_reduction <add>, %26, %cst_17 [0] : vector<32x128xf32> to vector<128xf32>
    %28 = vector.shape_cast %27 : vector<128xf32> to vector<1x128xf32>
    %29 = math.log %28 : vector<1x128xf32>
    %30 = arith.addf %23, %29 : vector<1x128xf32>
    %31 = vector.broadcast %30 : vector<1x128xf32> to vector<32x128xf32>
    %32 = arith.subf %21, %31 : vector<32x128xf32>
    %c0_18 = arith.constant 0 : index
    %c0_19 = arith.constant 0 : index
    %33 = vector.load %arg8[%c0_18, %c0_19] : memref<32x128xf32, #tpu.memory_space<vmem>>, vector<32x128xf32>
    %34 = math.log %33 : vector<32x128xf32>
    %cst_20 = arith.constant 0.000000e+00 : f32
    %35 = vector.broadcast %cst_20 : f32 to vector<32x128xf32>
    %36 = arith.subf %35, %34 : vector<32x128xf32>
    %37 = math.log %36 : vector<32x128xf32>
    %cst_21 = arith.constant 0.000000e+00 : f32
    %38 = vector.broadcast %cst_21 : f32 to vector<32x128xf32>
    %39 = arith.subf %38, %37 : vector<32x128xf32>
    %40 = arith.addf %32, %39 : vector<32x128xf32>
    %cst_22 = arith.constant 2.000000e+00 : f32
    %41 = vector.broadcast %cst_22 : f32 to vector<32x128xf32>
    %42 = arith.mulf %40, %41 : vector<32x128xf32>
    %cst_23 = arith.constant dense<0xFF800000> : vector<128xf32>
    %43 = vector.multi_reduction <maximumf>, %42, %cst_23 [0] : vector<32x128xf32> to vector<128xf32>
    %44 = vector.shape_cast %43 : vector<128xf32> to vector<1x128xf32>
    %45 = vector.broadcast %44 : vector<1x128xf32> to vector<32x128xf32>
    %46 = arith.subf %42, %45 : vector<32x128xf32>
    %47 = math.exp %46 : vector<32x128xf32>
    %cst_24 = arith.constant dense<0.000000e+00> : vector<128xf32>
    %48 = vector.multi_reduction <add>, %47, %cst_24 [0] : vector<32x128xf32> to vector<128xf32>
    %49 = vector.shape_cast %48 : vector<128xf32> to vector<1x128xf32>
    %cst_25 = arith.constant 1.000000e+00 : f32
    %50 = vector.broadcast %cst_25 : f32 to vector<1x128xf32>
    %51 = arith.divf %50, %49 : vector<1x128xf32>
    %52 = vector.broadcast %51 : vector<1x128xf32> to vector<32x128xf32>
    %53 = arith.mulf %47, %52 : vector<32x128xf32>
    %c0_26 = arith.constant 0 : index
    %c0_27 = arith.constant 0 : index
    %54 = vector.load %arg9[%c0_26, %c0_27] : memref<32x128xf32, #tpu.memory_space<vmem>>, vector<32x128xf32>
    tpu.vector_store %arg9[%c0_26, %c0_27], %32 {strides = array<i32>} : memref<32x128xf32, #tpu.memory_space<vmem>>, vector<32x128xf32>,
    %c0_28 = arith.constant 0 : index
    %c0_29 = arith.constant 0 : index
    %55 = vector.load %arg10[%c0_28, %c0_29] : memref<32x128xf32, #tpu.memory_space<vmem>>, vector<32x128xf32>
    tpu.vector_store %arg10[%c0_28, %c0_29], %53 {strides = array<i32>} : memref<32x128xf32, #tpu.memory_space<vmem>>, vector<32x128xf32>,
    return
  }
  func.func @transform_0(%arg0: i32) -> (i32, i32) {
    %c0_i32 = arith.constant 0 : i32
    %c0_i32_0 = arith.constant 0 : i32
    return %c0_i32, %arg0 : i32, i32
  }
  func.func @transform_1(%arg0: i32) -> (i32, i32) {
    %c0_i32 = arith.constant 0 : i32
    %c0_i32_0 = arith.constant 0 : i32
    %c0_i32_1 = arith.constant 0 : i32
    return %c0_i32, %c0_i32_0 : i32, i32
  }
  func.func @transform_2(%arg0: i32) -> (i32, i32) {
    %c0_i32 = arith.constant 0 : i32
    %c0_i32_0 = arith.constant 0 : i32
    %c0_i32_1 = arith.constant 0 : i32
    return %c0_i32, %c0_i32_0 : i32, i32
  }
  func.func @transform_3(%arg0: i32) -> (i32, i32) {
    %c0_i32 = arith.constant 0 : i32
    %c0_i32_0 = arith.constant 0 : i32
    %c0_i32_1 = arith.constant 0 : i32
    return %c0_i32, %c0_i32_0 : i32, i32
  }
  func.func @transform_4(%arg0: i32) -> (i32, i32) {
    %c0_i32 = arith.constant 0 : i32
    %c0_i32_0 = arith.constant 0 : i32
    %c0_i32_1 = arith.constant 0 : i32
    return %c0_i32, %c0_i32_0 : i32, i32
  }
  func.func @transform_5(%arg0: i32) -> (i32, i32) {
    %c0_i32 = arith.constant 0 : i32
    %c0_i32_0 = arith.constant 0 : i32
    %c0_i32_1 = arith.constant 0 : i32
    return %c0_i32, %c0_i32_0 : i32, i32
  }
  func.func @transform_6(%arg0: i32) -> (i32, i32) {
    %c0_i32 = arith.constant 0 : i32
    %c0_i32_0 = arith.constant 0 : i32
    %c0_i32_1 = arith.constant 0 : i32
    return %c0_i32, %c0_i32_0 : i32, i32
  }
  func.func @transform_7(%arg0: i32) -> (i32, i32) {
    %c0_i32 = arith.constant 0 : i32
    %c0_i32_0 = arith.constant 0 : i32
    return %c0_i32, %arg0 : i32, i32
  }
  func.func @transform_8(%arg0: i32) -> (i32, i32) {
    %c0_i32 = arith.constant 0 : i32
    %c0_i32_0 = arith.constant 0 : i32
    return %c0_i32, %arg0 : i32, i32
  }
  func.func @transform_9(%arg0: i32) -> (i32, i32) {
    %c0_i32 = arith.constant 0 : i32
    %c0_i32_0 = arith.constant 0 : i32
    return %c0_i32, %arg0 : i32, i32
  }
}

</mosaic_0001>

<bundles_post_ra>
// kernel: tpu_custom_call.1
= control target key start
LH: loop header
LB: loop body
LE: loop exit
PB: predicated region body
PF: predicated region fallthrough
CT: control target
= control target key end

     0   :  { %v541_v0 = vmov 0   ;;  %v542_v3 = vmov 0.0   ;;  %vm543_vm0 = vmmov 0   ;;  %vm60_vm1 = vcmask 64512   ;;  %s798_s1 = inlined_call_operand.vmem [shape: f32[8,1], index: 1, kind: input, shape index: {}]   ;;  %s799_s2 = inlined_call_operand.vmem [shape: f32[8,1], index: 2, kind: input, shape index: {}]   ;;  %s800_s6 = inlined_call_operand.vmem [shape: f32[32,1], index: 6, kind: input, shape index: {}]   ;;  %s801_s4 = inlined_call_operand.vmem [shape: f32[8,1], index: 4, kind: input, shape index: {}]   ;;  %s802_s0 = inlined_call_operand.vmem [shape: f32[1,128], index: 0, kind: input, shape index: {}]   ;;  %s803_s3 = inlined_call_operand.vmem [shape: f32[8,8], index: 3, kind: input, shape index: {}]   ;;  %s804_s5 = inlined_call_operand.vmem [shape: f32[32,8], index: 5, kind: input, shape index: {}]   ;;  %s805_s7 = inlined_call_operand.vmem [shape: f32[32,128], index: 7, kind: input, shape index: {}]   ;;  %s806_s8 = inlined_call_operand.vmem [shape: f32[128,32], index: 8, kind: output, shape index: {0}]   ;;  %s807_s9 = inlined_call_operand.vmem [shape: f32[128,32], index: 9, kind: output, shape index: {1}]  }
   0x1   :  { %503 = vset.pattern.permute.xlu0 %v541_v0  ;;  %v32_v1 = vld [vmem:[%s798_s1] sm:$0xff]  ;;  %504 = vset.pattern.permute.xlu1 %v541_v0  ;;  %v140_v4 = vld [vmem:[%s800_s6 + $0x8] sm:$0xff]  ;;  %v142_v6 = vld [vmem:[%s800_s6 + $0x18] sm:$0xff]  ;;  %vm401_vm2 = vcmask 261120  }
   0x2   :  { %35 = vperm.xlu0 %503, %v32_v1   ;;  %v45_v2 = vld [vmem:[%s799_s2] sm:$0xff]  ;;  %487 = vmatprep.subr.mxu0 %v542_v3  ;;  %v141_v8 = vld [vmem:[%s800_s6 + $0x10] sm:$0xff]  ;;  %v136_v22 = vld [vmem:[%s804_s5 + $0x8] sm:$0xff] }
   0x3   :  { %489 = vmatprep.mubr.msk.f32.mxu0 %vm543_vm0, %v542_v3  ;;  %v54_v5 = vld [vmem:[%s801_s4] sm:$0xff]  ;;  %v137_v23 = vld [vmem:[%s804_s5 + $0x10] sm:$0xff]  ;;  %v138_v24 = vld [vmem:[%s804_s5 + $0x18] sm:$0xff] }
   0x4   :  { %57 = vperm.xlu1 %504, %v54_v5   ;;  %v139_v7 = vld [vmem:[%s800_s6] sm:$0xff]  ;;  %v299_v46 = vld [vmem:[%s805_s7 + $0x10] sm:$0xff]  ;;  %v298_v55 = vld [vmem:[%s805_s7 + $0x8] sm:$0xff] }
   0x5   :  { %v474_v10 = vld [vmem:[%s802_s0] ss:$0 sm:$0xff]  ;;  %505 = vlog2.f32 %v299_v46  ;;  %v300_v57 = vld [vmem:[%s805_s7 + $0x18] sm:$0xff] }
   0x6   :  { %48 = vperm.xlu0 %503, %v45_v2   ;;  %v53_v15 = vld [vmem:[%s803_s3] sm:$0xff] }
   0x7   :  { %v135_v16 = vld [vmem:[%s804_s5] sm:$0xff] }
   0x8   :  { %145 = vperm.xlu1 %504, %v139_v7   ;;  %494 = vmatprep.mubr.msk.f32.mxu1 %vm60_vm1, %v135_v16  ;;  %v297_v50 = vld [vmem:[%s805_s7] sm:$0xff] }
   0x9   :  { %507 = vlog2.f32 %v297_v50 }
   0xa   :  { %150 = vperm.xlu0 %503, %v140_v4  }
   0xc   :  { %155 = vperm.xlu1 %504, %v141_v8  }
   0xe   :  { %160 = vperm.xlu0 %503, %v142_v6  }
  0x12   :  { %v506_v58 = vpop.eup %505 }
  0x13   :  { %v306_v4 = vmul.f32 0.6931472, %v506_v58 }
  0x16   :  { %v508_v59 = vpop.eup %507 }
  0x17   :  { %v302_v6 = vmul.f32 0.6931472, %v508_v59 }
  0x7d   :  { %v36_v9 = vpop.permute.xlu0 %35 }
  0x7e   :  { %v44_v11 = vmul.f32 %v474_v10, %v36_v9  ;;  %v311_v10 = vsub.f32 0.0, %v306_v4 }
  0x7f   :  { %v58_v17 = vpop.permute.xlu1 %57 }
  0x81   :  { %v49_v12 = vpop.permute.xlu0 %48 }
  0x82   :  { %v51_v13 = vadd.f32 %v49_v12, %v44_v11  ;;  %v309_v12 = vsub.f32 0.0, %v302_v6 }
  0x83   :  { %v146_v26 = vpop.permute.xlu1 %145 }
  0x84   :  { %v52_v14 = vmax.f32 %v51_v13, 0.0 }
  0x85   :  { %v151_v25 = vpop.permute.xlu0 %150 }
  0x86   :  { %488 = vmatpush3.msra.mxu0 %v52_v14 }
  0x87   :  { %490 = vmatmul.mubr.msk.f32.vlgmr.msra.gmra.mxu0 %vm60_vm1, %v53_v15  ;;  %v156_v32 = vpop.permute.xlu1 %155 }
  0x89   :  { %v161_v30 = vpop.permute.xlu0 %160 }
 0x147   :  { %v130_v18 = vpop.f32.mrf.mxu0 }
 0x148   :  { %v131_v19 = vadd.f32 %v130_v18, %v58_v17 }
 0x149   :  { %v491_v20 = vpop.f32.mrf.mxu0 }
 0x14a   :  { %v134_v21 = vmax.f32 %v131_v19, 0.0 }
 0x14c   :  { %492 = vmatprep.subr.mxu1 %v134_v21 }
 0x14d   :  { %493 = vmatpush3.msra.mxu1 %v134_v21 }
 0x14e   :  { %495 = vmatmul.mubr.msk.f32.vlgmr.msra.gmra.mxu1 %vm60_vm1, %v136_v22 }
 0x14f   :  { %497 = vmatprep.mubr.msk.f32.mxu1 %vm60_vm1, %v137_v23 }
 0x152   :  { %498 = vmatmul.mubr.msk.f32.gmra.mxu1 %vm60_vm1, %v138_v24 }
 0x20e   :  { %v496_v27 = vpop.f32.mrf.mxu1 }
 0x20f   :  { %v640_v34 = vadd.f32 %v496_v27, %v151_v25 }
 0x210   :  { %v241_v28 = vpop.f32.mrf.mxu1 }
 0x211   :  { %v638_v31 = vadd.f32 %v241_v28, %v146_v26 }
 0x212   :  { %v499_v29 = vpop.f32.mrf.mxu1 }
 0x213   :  { %v642_v35 = vadd.f32 %v499_v29, %v161_v30  ;;  %v260_v37 = vmax.f32 %v638_v31, %v640_v34 }
 0x214   :  { %v251_v33 = vpop.f32.mrf.mxu1 }
 0x215   :  { %v644_v36 = vadd.f32 %v251_v33, %v156_v32 }
 0x217   :  { %v261_v38 = vmax.f32 %v644_v36, %v642_v35 }
 0x219   :  { %v262_v39 = vmax.f32 %v260_v37, %v261_v38 }
 0x21b   :  { %v263_v40 = vrot.slane %v262_v39, 4 }
 0x21d   :  { %v264_v41 = vmax.f32 %v262_v39, %v263_v40 }
 0x21f   :  { %v265_v42 = vrot.slane %v264_v41, 2 }
 0x221   :  { %v266_v43 = vmax.f32 %v264_v41, %v265_v42 }
 0x223   :  { %v267_v44 = vrot.slane %v266_v43, 1 }
 0x225   :  { %v268_v45 = vmax.f32 %v266_v43, %v267_v44 }
 0x227   :  { %v269_v47 = vsub.f32 %v638_v31, %v268_v45  ;;  %v270_v48 = vsub.f32 %v640_v34, %v268_v45  ;;  %v271_v49 = vsub.f32 %v644_v36, %v268_v45  ;;  %v272_v51 = vsub.f32 %v642_v35, %v268_v45 }
 0x229   :  { %v273_v52 = vmul.f32 1.442695, %v269_v47  ;;  %v275_v53 = vmul.f32 1.442695, %v270_v48  ;;  %v277_v54 = vmul.f32 1.442695, %v271_v49 }
 0x22a   :  { %v279_v56 = vmul.f32 1.442695, %v272_v51 }
 0x22b   :  { %509 = vpow2.f32 %v273_v52 }
 0x22c   :  { %511 = vpow2.f32 %v275_v53 }
 0x22d   :  { %513 = vlog2.f32 %v298_v55 }
 0x22e   :  { %515 = vpow2.f32 %v277_v54 }
 0x22f   :  { %517 = vlog2.f32 %v300_v57 }
 0x230   :  { %519 = vpow2.f32 %v279_v56 }
 0x231   :  { %521 = vlog2.f32 %v311_v10 }
 0x232   :  { %523 = vlog2.f32 %v309_v12 }
 0x238   :  { %v510_v60 = vpop.eup %509 }
 0x239   :  { %v512_v61 = vpop.eup %511 }
 0x23a   :  { %v514_v62 = vpop.eup %513  ;;  %v281_v63 = vadd.f32 %v512_v61, %v510_v60 }
 0x23b   :  { %v516_v0 = vpop.eup %515  ;;  %v304_v7 = vmul.f32 0.6931472, %v514_v62 }
 0x23c   :  { %v518_v1 = vpop.eup %517  ;;  %v282_v2 = vadd.f32 %v516_v0, %v281_v63 }
 0x23d   :  { %v520_v3 = vpop.eup %519  ;;  %v308_v9 = vmul.f32 0.6931472, %v518_v1  ;;  %v310_v13 = vsub.f32 0.0, %v304_v7 }
 0x23e   :  { %v283_v5 = vadd.f32 %v520_v3, %v282_v2  ;;  %v522_v19 = vpop.eup %521 }
 0x23f   :  { %v312_v15 = vsub.f32 0.0, %v308_v9  ;;  %525 = vlog2.f32 %v310_v13  ;;  %v524_v20 = vpop.eup %523  ;;  %v318_v23 = vmul.f32 0.6931472, %v522_v19 }
 0x240   :  { %v284_v8 = vrot.slane %v283_v5, 4  ;;  %v314_v24 = vmul.f32 0.6931472, %v524_v20 }
 0x241   :  { %527 = vlog2.f32 %v312_v15  ;;  %v323_v29 = vsub.f32 0.0, %v318_v23 }
 0x242   :  { %v285_v11 = vadd.f32 %v284_v8, %v283_v5  ;;  %v321_v32 = vsub.f32 0.0, %v314_v24 }
 0x244   :  { %v286_v14 = vrot.slane %v285_v11, 2 }
 0x246   :  { %v287_v16 = vadd.f32 %v286_v14, %v285_v11 }
 0x248   :  { %v288_v17 = vrot.slane %v287_v16, 1 }
 0x24a   :  { %v289_v18 = vadd.f32 %v288_v17, %v287_v16 }
 0x24c   :  { %529 = vlog2.f32 %v289_v18  ;;  %v526_v21 = vpop.eup %525 }
 0x24d   :  { %v316_v25 = vmul.f32 0.6931472, %v526_v21 }
 0x24e   :  { %v528_v22 = vpop.eup %527 }
 0x24f   :  { %v320_v26 = vmul.f32 0.6931472, %v528_v22  ;;  %v322_v33 = vsub.f32 0.0, %v316_v25 }
 0x251   :  { %v324_v37 = vsub.f32 0.0, %v320_v26 }
 0x259   :  { %v530_v27 = vpop.eup %529 }
 0x25a   :  { %v291_v28 = vmul.f32 0.6931472, %v530_v27 }
 0x25c   :  { %v292_v30 = vadd.f32 %v291_v28, %v268_v45 }
 0x25e   :  { %v295_v38 = vsub.f32 %v644_v36, %v292_v30  ;;  %v293_v39 = vsub.f32 %v638_v31, %v292_v30  ;;  %v294_v40 = vsub.f32 %v640_v34, %v292_v30  ;;  %v296_v41 = vsub.f32 %v642_v35, %v292_v30 }
 0x260   :  { %v327_v42 = vadd.f32 %v323_v29, %v295_v38  ;;  %369 = vxpose.xlu1.b32.start [1/4] (short) %v293_v39, 128  ;;  %v325_v43 = vadd.f32 %v321_v32, %v293_v39  ;;  %v326_v44 = vadd.f32 %v322_v33, %v294_v40  ;;  %v328_v46 = vadd.f32 %v324_v37, %v296_v41 }
 0x262   :  { %v331_v47 = vmul.f32 2.0, %v327_v42  ;;  %v329_v48 = vmul.f32 2.0, %v325_v43  ;;  %v330_v49 = vmul.f32 2.0, %v326_v44  ;;  %v332_v45 = vmul.f32 2.0, %v328_v46 }
 0x264   :  { %370 = vxpose.xlu1.b32.cont [2/4] (short) %v294_v40, 128  ;;  %v333_v50 = vmax.f32 %v329_v48, %v330_v49  ;;  %v334_v51 = vmax.f32 %v331_v47, %v332_v45 }
 0x266   :  { %v335_v52 = vmax.f32 %v333_v50, %v334_v51 }
 0x268   :  { %371 = vxpose.xlu1.b32.cont [3/4] (short) %v295_v38, 128  ;;  %v336_v36 = vrot.slane %v335_v52, 4 }
 0x26a   :  { %v337_v31 = vmax.f32 %v335_v52, %v336_v36 }
 0x26c   :  { %372 = vxpose.xlu1.b32.end [4/4] (short) %v296_v41, 128  ;;  %v338_v34 = vrot.slane %v337_v31, 2 }
 0x26e   :  { %v339_v53 = vmax.f32 %v337_v31, %v338_v34 }
 0x270   :  { %v340_v35 = vrot.slane %v339_v53, 1 }
 0x272   :  { %v341_v54 = vmax.f32 %v339_v53, %v340_v35 }
 0x274   :  { %v343_v55 = vsub.f32 %v330_v49, %v341_v54  ;;  %v342_v56 = vsub.f32 %v329_v48, %v341_v54  ;;  %v344_v57 = vsub.f32 %v331_v47, %v341_v54  ;;  %v345_v59 = vsub.f32 %v332_v45, %v341_v54 }
 0x276   :  { %v348_v58 = vmul.f32 1.442695, %v343_v55  ;;  %v346_v60 = vmul.f32 1.442695, %v342_v56  ;;  %v350_v61 = vmul.f32 1.442695, %v344_v57 }
 0x277   :  { %v352_v62 = vmul.f32 1.442695, %v345_v59 }
 0x278   :  { %531 = vpow2.f32 %v348_v58 }
 0x279   :  { %533 = vpow2.f32 %v346_v60 }
 0x27a   :  { %535 = vpow2.f32 %v350_v61 }
 0x27b   :  { %537 = vpow2.f32 %v352_v62 }
 0x285   :  { %v532_v63 = vpop.eup %531 }
 0x286   :  { %v534_v0 = vpop.eup %533 }
 0x287   :  { %v354_v1 = vadd.f32 %v534_v0, %v532_v63  ;;  %v536_v2 = vpop.eup %535 }
 0x288   :  { %v538_v4 = vpop.eup %537 }
 0x289   :  { %v355_v3 = vadd.f32 %v536_v2, %v354_v1 }
 0x28b   :  { %v356_v5 = vadd.f32 %v538_v4, %v355_v3 }
 0x28d   :  { %v357_v6 = vrot.slane %v356_v5, 4 }
 0x28f   :  { %v358_v7 = vadd.f32 %v357_v6, %v356_v5 }
 0x291   :  { %v359_v8 = vrot.slane %v358_v7, 2 }
 0x293   :  { %v360_v9 = vadd.f32 %v359_v8, %v358_v7 }
 0x295   :  { %v361_v10 = vrot.slane %v360_v9, 1 }
 0x297   :  { %v362_v11 = vadd.f32 %v361_v10, %v360_v9 }
 0x299   :  { %539 = vrcp.f32 %v362_v11 }
 0x2a6   :  { %v540_v12 = vpop.eup %539 }
 0x2a7   :  { %v365_v13 = vmul.f32 %v540_v12, %v534_v0  ;;  %v366_v14 = vmul.f32 %v540_v12, %v532_v63  ;;  %v367_v15 = vmul.f32 %v540_v12, %v536_v2  ;;  %v368_v16 = vmul.f32 %v540_v12, %v538_v4 }
 0x2a9   :  { %418 = vxpose.xlu0.b32.start [1/4] (short) %v365_v13, 128 }
 0x2ad   :  { %419 = vxpose.xlu0.b32.cont [2/4] (short) %v366_v14, 128 }
 0x2b1   :  { %420 = vxpose.xlu0.b32.cont [3/4] (short) %v367_v15, 128 }
 0x2b5   :  { %421 = vxpose.xlu0.b32.end [4/4] (short) %v368_v16, 128 }
 0x2dc   :  { %v385_v17 = vpop.trf.xlu1 }
 0x2dd   :  { %402 = vst.msk [vmem:[%s806_s8] sm:$0xff] %vm401_vm2, %v385_v17 }
 0x2e0   :  { %v386_v18 = vpop.trf.xlu1 }
 0x2e1   :  { %403 = vst.msk [vmem:[%s806_s8 + $0x8] sm:$0xff] %vm401_vm2, %v386_v18 }
 0x2e4   :  { %v387_v19 = vpop.trf.xlu1 }
 0x2e5   :  { %404 = vst.msk [vmem:[%s806_s8 + $0x10] sm:$0xff] %vm401_vm2, %v387_v19 }
 0x2e8   :  { %v388_v20 = vpop.trf.xlu1 }
 0x2e9   :  { %405 = vst.msk [vmem:[%s806_s8 + $0x18] sm:$0xff] %vm401_vm2, %v388_v20 }
 0x2ec   :  { %v389_v21 = vpop.trf.xlu1 }
 0x2ed   :  { %406 = vst.msk [vmem:[%s806_s8 + $0x20] sm:$0xff] %vm401_vm2, %v389_v21 }
 0x2f0   :  { %v390_v22 = vpop.trf.xlu1 }
 0x2f1   :  { %407 = vst.msk [vmem:[%s806_s8 + $0x28] sm:$0xff] %vm401_vm2, %v390_v22 }
 0x2f4   :  { %v391_v23 = vpop.trf.xlu1 }
 0x2f5   :  { %408 = vst.msk [vmem:[%s806_s8 + $0x30] sm:$0xff] %vm401_vm2, %v391_v23 }
 0x2f8   :  { %v392_v24 = vpop.trf.xlu1 }
 0x2f9   :  { %409 = vst.msk [vmem:[%s806_s8 + $0x38] sm:$0xff] %vm401_vm2, %v392_v24 }
 0x2fc   :  { %v393_v25 = vpop.trf.xlu1 }
 0x2fd   :  { %410 = vst.msk [vmem:[%s806_s8 + $0x40] sm:$0xff] %vm401_vm2, %v393_v25 }
 0x300   :  { %v394_v26 = vpop.trf.xlu1 }
 0x301   :  { %411 = vst.msk [vmem:[%s806_s8 + $0x48] sm:$0xff] %vm401_vm2, %v394_v26 }
 0x304   :  { %v395_v27 = vpop.trf.xlu1 }
 0x305   :  { %412 = vst.msk [vmem:[%s806_s8 + $0x50] sm:$0xff] %vm401_vm2, %v395_v27 }
 0x308   :  { %v396_v28 = vpop.trf.xlu1 }
 0x309   :  { %413 = vst.msk [vmem:[%s806_s8 + $0x58] sm:$0xff] %vm401_vm2, %v396_v28 }
 0x30c   :  { %v397_v29 = vpop.trf.xlu1 }
 0x30d   :  { %414 = vst.msk [vmem:[%s806_s8 + $0x60] sm:$0xff] %vm401_vm2, %v397_v29 }
 0x310   :  { %v398_v30 = vpop.trf.xlu1 }
 0x311   :  { %415 = vst.msk [vmem:[%s806_s8 + $0x68] sm:$0xff] %vm401_vm2, %v398_v30 }
 0x314   :  { %v399_v32 = vpop.trf.xlu1 }
 0x315   :  { %416 = vst.msk [vmem:[%s806_s8 + $0x70] sm:$0xff] %vm401_vm2, %v399_v32 }
 0x318   :  { %v400_v33 = vpop.trf.xlu1 }
 0x319   :  { %417 = vst.msk [vmem:[%s806_s8 + $0x78] sm:$0xff] %vm401_vm2, %v400_v33 }
 0x325   :  { %v434_v37 = vpop.trf.xlu0 }
 0x326   :  { %450 = vst.msk [vmem:[%s807_s9] sm:$0xff] %vm401_vm2, %v434_v37 }
 0x329   :  { %v435_v38 = vpop.trf.xlu0 }
 0x32a   :  { %451 = vst.msk [vmem:[%s807_s9 + $0x8] sm:$0xff] %vm401_vm2, %v435_v38 }
 0x32d   :  { %v436_v39 = vpop.trf.xlu0 }
 0x32e   :  { %452 = vst.msk [vmem:[%s807_s9 + $0x10] sm:$0xff] %vm401_vm2, %v436_v39 }
 0x331   :  { %v437_v40 = vpop.trf.xlu0 }
 0x332   :  { %453 = vst.msk [vmem:[%s807_s9 + $0x18] sm:$0xff] %vm401_vm2, %v437_v40 }
 0x335   :  { %v438_v41 = vpop.trf.xlu0 }
 0x336   :  { %454 = vst.msk [vmem:[%s807_s9 + $0x20] sm:$0xff] %vm401_vm2, %v438_v41 }
 0x339   :  { %v439_v42 = vpop.trf.xlu0 }
 0x33a   :  { %455 = vst.msk [vmem:[%s807_s9 + $0x28] sm:$0xff] %vm401_vm2, %v439_v42 }
 0x33d   :  { %v440_v43 = vpop.trf.xlu0 }
 0x33e   :  { %456 = vst.msk [vmem:[%s807_s9 + $0x30] sm:$0xff] %vm401_vm2, %v440_v43 }
 0x341   :  { %v441_v44 = vpop.trf.xlu0 }
 0x342   :  { %457 = vst.msk [vmem:[%s807_s9 + $0x38] sm:$0xff] %vm401_vm2, %v441_v44 }
 0x345   :  { %v442_v46 = vpop.trf.xlu0 }
 0x346   :  { %458 = vst.msk [vmem:[%s807_s9 + $0x40] sm:$0xff] %vm401_vm2, %v442_v46 }
 0x349   :  { %v443_v47 = vpop.trf.xlu0 }
 0x34a   :  { %459 = vst.msk [vmem:[%s807_s9 + $0x48] sm:$0xff] %vm401_vm2, %v443_v47 }
 0x34d   :  { %v444_v48 = vpop.trf.xlu0 }
 0x34e   :  { %460 = vst.msk [vmem:[%s807_s9 + $0x50] sm:$0xff] %vm401_vm2, %v444_v48 }
 0x351   :  { %v445_v49 = vpop.trf.xlu0 }
 0x352   :  { %461 = vst.msk [vmem:[%s807_s9 + $0x58] sm:$0xff] %vm401_vm2, %v445_v49 }
 0x355   :  { %v446_v45 = vpop.trf.xlu0 }
 0x356   :  { %462 = vst.msk [vmem:[%s807_s9 + $0x60] sm:$0xff] %vm401_vm2, %v446_v45 }
 0x359   :  { %v447_v50 = vpop.trf.xlu0 }
 0x35a   :  { %463 = vst.msk [vmem:[%s807_s9 + $0x68] sm:$0xff] %vm401_vm2, %v447_v50 }
 0x35d   :  { %v448_v51 = vpop.trf.xlu0 }
 0x35e   :  { %464 = vst.msk [vmem:[%s807_s9 + $0x70] sm:$0xff] %vm401_vm2, %v448_v51 }
 0x361   :  { %v449_v52 = vpop.trf.xlu0 }
 0x362   :  { %465 = vst.msk [vmem:[%s807_s9 + $0x78] sm:$0xff] %vm401_vm2, %v449_v52 }

// kernel: tpu_custom_call.1
= control target key start
LH: loop header
LB: loop body
LE: loop exit
PB: predicated region body
PF: predicated region fallthrough
CT: control target
= control target key end

     0   :  { %15 = vsyncpa [#allocation3], 0  ;;  %v526_v1 = vmov 0   ;;  %s678_s0 = inlined_call_operand.vmem [shape: f32[1,128], index: 0, kind: input, shape index: {}]   ;;  %s679_s1 = inlined_call_operand.vmem [shape: f32[8,1], index: 1, kind: input, shape index: {}]   ;;  %s680_s2 = inlined_call_operand.vmem [shape: f32[8,1], index: 2, kind: input, shape index: {}]   ;;  %s681_s3 = inlined_call_operand.vmem [shape: f32[8,8], index: 3, kind: input, shape index: {}]   ;;  %s682_s4 = inlined_call_operand.vmem [shape: f32[8,1], index: 4, kind: input, shape index: {}]   ;;  %s683_s5 = inlined_call_operand.vmem [shape: f32[32,8], index: 5, kind: input, shape index: {}]   ;;  %s684_s6 = inlined_call_operand.vmem [shape: f32[32,1], index: 6, kind: input, shape index: {}]   ;;  %s685_s7 = inlined_call_operand.vmem [shape: f32[32,128], index: 7, kind: input, shape index: {}]   ;;  %s686_s8 = inlined_call_operand.hbm [shape: f32[32,128], index: 8, kind: output, shape index: {0}]   ;;  %s687_s9 = inlined_call_operand.hbm [shape: f32[32,128], index: 9, kind: output, shape index: {1}]  }
   0x1   :  { %v34_v0 = vld [vmem:[%s679_s1] sm:$0xff]  ;;  %444 = vset.pattern.permute.xlu0 %v526_v1  ;;  %445 = vset.pattern.permute.xlu1 %v526_v1 }
   0x2   :  { %16 = vsyncpa [#allocation5], 0  ;;  %37 = vperm.xlu0 %444, %v34_v0   ;;  %v47_v2 = vld [vmem:[%s680_s2] sm:$0xff]  ;;  %v527_v3 = vmov 0.0   ;;  %vm528_vm0 = vmmov 0   ;;  %v142_v4 = vld [vmem:[%s684_s6 + $0x8] sm:$0xff] }
   0x3   :  { %424 = vmatprep.subr.mxu0 %v527_v3  ;;  %426 = vmatprep.mubr.msk.f32.mxu0 %vm528_vm0, %v527_v3  ;;  %v56_v5 = vld [vmem:[%s682_s4] sm:$0xff]  ;;  %v144_v6 = vld [vmem:[%s684_s6 + $0x18] sm:$0xff]  ;;  %v143_v8 = vld [vmem:[%s684_s6 + $0x10] sm:$0xff]  ;;  %vm62_vm1 = vcmask 64512  }
   0x4   :  { %59 = vperm.xlu1 %445, %v56_v5   ;;  %v141_v7 = vld [vmem:[%s684_s6] sm:$0xff]  ;;  %v138_v22 = vld [vmem:[%s683_s5 + $0x8] sm:$0xff]  ;;  %v139_v23 = vld [vmem:[%s683_s5 + $0x10] sm:$0xff] }
   0x5   :  { %v411_v10 = vld [vmem:[%s678_s0] ss:$0 sm:$0xff]  ;;  %v140_v24 = vld [vmem:[%s683_s5 + $0x18] sm:$0xff]  ;;  %v300_v50 = vld [vmem:[%s685_s7 + $0x8] sm:$0xff] }
   0x6   :  { %50 = vperm.xlu0 %444, %v47_v2   ;;  %v55_v15 = vld [vmem:[%s681_s3] sm:$0xff]  ;;  %v301_v55 = vld [vmem:[%s685_s7 + $0x10] sm:$0xff]  ;;  %v302_v57 = vld [vmem:[%s685_s7 + $0x18] sm:$0xff] }
   0x7   :  { %v137_v16 = vld [vmem:[%s683_s5] sm:$0xff] }
   0x8   :  { %147 = vperm.xlu1 %445, %v141_v7   ;;  %431 = vmatprep.mubr.msk.f32.mxu1 %vm62_vm1, %v137_v16  ;;  %v299_v46 = vld [vmem:[%s685_s7] sm:$0xff]  ;;  %s529_s7 = smov [#allocation2]  }
   0x9   :  { %446 = vlog2.f32 %v299_v46  ;;  %s384_s15 = sshll.u32 %s529_s7, 4  ;;  %s385_s15 = int_to_ptr.vmem [resolvable:$true] %s384_s15 }
   0xa   :  { %152 = vperm.xlu0 %444, %v142_v4   ;;  %448 = vlog2.f32 %v300_v50  ;;  %s482_s1 = scalar_lea.vmem %s385_s15, 512  ;;  %p487_p1 = scmp.lt.s32.totalorder %s385_s15, %s385_s15 }
   0xb   :  { %p483_p0 = scmp.ne.s32.totalorder %s385_s15, %s482_s1  ;;  %p488_p2 = scmp.lt.s32.totalorder %s482_s1, %s482_s1 }
   0xc   :  { %157 = vperm.xlu1 %445, %v143_v8  }
   0xd   :  { %p489_p3 = por %p488_p2, %p487_p1 }
   0xe   :  { %162 = vperm.xlu0 %444, %v144_v6  }
   0xf   :  { %p490_p4 = pnand %p489_p3, %p483_p0 }
  0x16   :  { %v447_v58 = vpop.eup %446 }
  0x17   :  { %v449_v59 = vpop.eup %448  ;;  %v304_v4 = vmul.f32 0.6931472, %v447_v58 }
  0x18   :  { %v306_v6 = vmul.f32 0.6931472, %v449_v59 }
  0x7d   :  { %v38_v9 = vpop.permute.xlu0 %37 }
  0x7e   :  { %v46_v11 = vmul.f32 %v411_v10, %v38_v9  ;;  %v311_v10 = vsub.f32 0.0, %v304_v4 }
  0x7f   :  { %v60_v17 = vpop.permute.xlu1 %59 }
  0x81   :  { %v51_v12 = vpop.permute.xlu0 %50 }
  0x82   :  { %v53_v13 = vadd.f32 %v51_v12, %v46_v11  ;;  %v312_v12 = vsub.f32 0.0, %v306_v6 }
  0x83   :  { %v148_v26 = vpop.permute.xlu1 %147 }
  0x84   :  { %v54_v14 = vmax.f32 %v53_v13, 0.0 }
  0x85   :  { %v153_v25 = vpop.permute.xlu0 %152 }
  0x86   :  { %425 = vmatpush3.msra.mxu0 %v54_v14 }
  0x87   :  { %427 = vmatmul.mubr.msk.f32.vlgmr.msra.gmra.mxu0 %vm62_vm1, %v55_v15  ;;  %v158_v32 = vpop.permute.xlu1 %157 }
  0x89   :  { %v163_v30 = vpop.permute.xlu0 %162 }
 0x147   :  { %v132_v18 = vpop.f32.mrf.mxu0 }
 0x148   :  { %v133_v19 = vadd.f32 %v132_v18, %v60_v17 }
 0x149   :  { %v428_v20 = vpop.f32.mrf.mxu0 }
 0x14a   :  { %v136_v21 = vmax.f32 %v133_v19, 0.0 }
 0x14c   :  { %429 = vmatprep.subr.mxu1 %v136_v21 }
 0x14d   :  { %430 = vmatpush3.msra.mxu1 %v136_v21 }
 0x14e   :  { %432 = vmatmul.mubr.msk.f32.vlgmr.msra.gmra.mxu1 %vm62_vm1, %v138_v22 }
 0x14f   :  { %434 = vmatprep.mubr.msk.f32.mxu1 %vm62_vm1, %v139_v23 }
 0x152   :  { %435 = vmatmul.mubr.msk.f32.gmra.mxu1 %vm62_vm1, %v140_v24 }
 0x20e   :  { %v433_v27 = vpop.f32.mrf.mxu1 }
 0x20f   :  { %v629_v34 = vadd.f32 %v433_v27, %v153_v25 }
 0x210   :  { %v243_v28 = vpop.f32.mrf.mxu1 }
 0x211   :  { %v627_v31 = vadd.f32 %v243_v28, %v148_v26 }
 0x212   :  { %v436_v29 = vpop.f32.mrf.mxu1 }
 0x213   :  { %v631_v35 = vadd.f32 %v436_v29, %v163_v30  ;;  %v262_v37 = vmax.f32 %v627_v31, %v629_v34 }
 0x214   :  { %v253_v33 = vpop.f32.mrf.mxu1 }
 0x215   :  { %v633_v36 = vadd.f32 %v253_v33, %v158_v32 }
 0x217   :  { %v263_v38 = vmax.f32 %v633_v36, %v631_v35 }
 0x219   :  { %v264_v39 = vmax.f32 %v262_v37, %v263_v38 }
 0x21b   :  { %v265_v40 = vrot.slane %v264_v39, 4 }
 0x21d   :  { %v266_v41 = vmax.f32 %v264_v39, %v265_v40 }
 0x21f   :  { %v267_v42 = vrot.slane %v266_v41, 2 }
 0x221   :  { %v268_v43 = vmax.f32 %v266_v41, %v267_v42 }
 0x223   :  { %v269_v44 = vrot.slane %v268_v43, 1 }
 0x225   :  { %v639_v45 = vmax.f32 %v268_v43, %v269_v44 }
 0x227   :  { %v271_v47 = vsub.f32 %v627_v31, %v639_v45  ;;  %v272_v48 = vsub.f32 %v629_v34, %v639_v45  ;;  %v273_v49 = vsub.f32 %v633_v36, %v639_v45  ;;  %v274_v51 = vsub.f32 %v631_v35, %v639_v45 }
 0x229   :  { %v275_v52 = vmul.f32 1.442695, %v271_v47  ;;  %v277_v53 = vmul.f32 1.442695, %v272_v48  ;;  %v279_v54 = vmul.f32 1.442695, %v273_v49 }
 0x22a   :  { %v281_v56 = vmul.f32 1.442695, %v274_v51 }
 0x22b   :  { %450 = vpow2.f32 %v275_v52 }
 0x22c   :  { %452 = vpow2.f32 %v277_v53 }
 0x22d   :  { %454 = vlog2.f32 %v301_v55 }
 0x22e   :  { %456 = vpow2.f32 %v279_v54 }
 0x22f   :  { %458 = vlog2.f32 %v302_v57 }
 0x230   :  { %460 = vpow2.f32 %v281_v56 }
 0x231   :  { %462 = vlog2.f32 %v311_v10 }
 0x232   :  { %464 = vlog2.f32 %v312_v12 }
 0x238   :  { %v451_v60 = vpop.eup %450 }
 0x239   :  { %v453_v61 = vpop.eup %452 }
 0x23a   :  { %v455_v62 = vpop.eup %454  ;;  %v283_v63 = vadd.f32 %v453_v61, %v451_v60 }
 0x23b   :  { %v457_v0 = vpop.eup %456  ;;  %v308_v7 = vmul.f32 0.6931472, %v455_v62 }
 0x23c   :  { %v459_v1 = vpop.eup %458  ;;  %v284_v2 = vadd.f32 %v457_v0, %v283_v63 }
 0x23d   :  { %v461_v3 = vpop.eup %460  ;;  %v310_v9 = vmul.f32 0.6931472, %v459_v1  ;;  %v313_v13 = vsub.f32 0.0, %v308_v7 }
 0x23e   :  { %v285_v5 = vadd.f32 %v461_v3, %v284_v2  ;;  %v463_v19 = vpop.eup %462 }
 0x23f   :  { %v314_v15 = vsub.f32 0.0, %v310_v9  ;;  %466 = vlog2.f32 %v313_v13  ;;  %v465_v20 = vpop.eup %464  ;;  %v316_v23 = vmul.f32 0.6931472, %v463_v19 }
 0x240   :  { %v286_v8 = vrot.slane %v285_v5, 4  ;;  %v318_v24 = vmul.f32 0.6931472, %v465_v20 }
 0x241   :  { %468 = vlog2.f32 %v314_v15  ;;  %v323_v29 = vsub.f32 0.0, %v316_v23 }
 0x242   :  { %v287_v11 = vadd.f32 %v286_v8, %v285_v5  ;;  %v324_v32 = vsub.f32 0.0, %v318_v24 }
 0x244   :  { %v288_v14 = vrot.slane %v287_v11, 2 }
 0x246   :  { %v289_v16 = vadd.f32 %v288_v14, %v287_v11 }
 0x248   :  { %v290_v17 = vrot.slane %v289_v16, 1 }
 0x24a   :  { %v291_v18 = vadd.f32 %v290_v17, %v289_v16 }
 0x24c   :  { %470 = vlog2.f32 %v291_v18  ;;  %v467_v21 = vpop.eup %466 }
 0x24d   :  { %v320_v25 = vmul.f32 0.6931472, %v467_v21 }
 0x24e   :  { %v469_v22 = vpop.eup %468 }
 0x24f   :  { %v322_v26 = vmul.f32 0.6931472, %v469_v22  ;;  %v325_v33 = vsub.f32 0.0, %v320_v25 }
 0x251   :  { %v326_v37 = vsub.f32 0.0, %v322_v26 }
 0x259   :  { %v471_v27 = vpop.eup %470 }
 0x25a   :  { %v293_v28 = vmul.f32 0.6931472, %v471_v27 }
 0x25c   :  { %v294_v30 = vadd.f32 %v293_v28, %v639_v45 }
 0x25e   :  { %v295_v38 = vsub.f32 %v627_v31, %v294_v30  ;;  %v296_v39 = vsub.f32 %v629_v34, %v294_v30  ;;  %v297_v40 = vsub.f32 %v633_v36, %v294_v30  ;;  %v298_v41 = vsub.f32 %v631_v35, %v294_v30 }
 0x260   :  { %v327_v42 = vadd.f32 %v323_v29, %v295_v38  ;;  %v328_v43 = vadd.f32 %v324_v32, %v296_v39  ;;  %v329_v44 = vadd.f32 %v325_v33, %v297_v40  ;;  %v330_v46 = vadd.f32 %v326_v37, %v298_v41  ;;  %373 = vst [vmem:[#allocation2 + $0x10] sm:$0xff] %v297_v40 }
 0x261   :  { %371 = vst [vmem:[#allocation2] sm:$0xff] %v295_v38  ;;  %372 = vst [vmem:[#allocation2 + $0x8] sm:$0xff] %v296_v39 }
 0x262   :  { %374 = vst [vmem:[#allocation2 + $0x18] sm:$0xff] %v298_v41 }
 0x263   :  { %493 = shalt.err (!%p490_p4)
}
 0x264   :  { %s530_s16 = smov 128   ;;  %s531_s17 = smov 8   ;;  %v331_v31 = vmul.f32 2.0, %v327_v42  ;;  %v332_v34 = vmul.f32 2.0, %v328_v43  ;;  %v333_v35 = vmul.f32 2.0, %v329_v44  ;;  %v334_v36 = vmul.f32 2.0, %v330_v46 }
 0x265   :  { %390 = dma.vmem_to_hbm [thread:$0]  %s385_s15, 512, %s686_s8, [#allocation3], %s530_s16, %s530_s16, %s531_s17  }
 0x266   :  { %v335_v45 = vmax.f32 %v331_v31, %v332_v34  ;;  %v336_v47 = vmax.f32 %v333_v35, %v334_v36  ;;  %s532_s8 = smov [#allocation4]  }
 0x267   :  { %s396_s19 = sshll.u32 %s532_s8, 4  ;;  %s397_s19 = int_to_ptr.vmem [resolvable:$true] %s396_s19 }
 0x268   :  { %v337_v48 = vmax.f32 %v335_v45, %v336_v47  ;;  %s502_s20 = scalar_lea.vmem %s397_s19, 512  ;;  %p507_p6 = scmp.lt.s32.totalorder %s397_s19, %s397_s19 }
 0x269   :  { %p503_p5 = scmp.ne.s32.totalorder %s397_s19, %s502_s20  ;;  %p508_p7 = scmp.lt.s32.totalorder %s502_s20, %s502_s20 }
 0x26a   :  { %v338_v49 = vrot.slane %v337_v48, 4 }
 0x26b   :  { %p509_p8 = por %p508_p7, %p507_p6 }
 0x26c   :  { %v339_v50 = vmax.f32 %v337_v48, %v338_v49 }
 0x26d   :  { %p510_p9 = pnand %p509_p8, %p503_p5 }
 0x26e   :  { %v340_v51 = vrot.slane %v339_v50, 2 }
 0x270   :  { %v341_v52 = vmax.f32 %v339_v50, %v340_v51 }
 0x272   :  { %v342_v53 = vrot.slane %v341_v52, 1 }
 0x274   :  { %v343_v54 = vmax.f32 %v341_v52, %v342_v53 }
 0x276   :  { %v344_v55 = vsub.f32 %v331_v31, %v343_v54  ;;  %v345_v56 = vsub.f32 %v332_v34, %v343_v54  ;;  %v346_v57 = vsub.f32 %v333_v35, %v343_v54  ;;  %v347_v58 = vsub.f32 %v334_v36, %v343_v54 }
 0x278   :  { %v348_v59 = vmul.f32 1.442695, %v344_v55  ;;  %v350_v60 = vmul.f32 1.442695, %v345_v56  ;;  %v352_v61 = vmul.f32 1.442695, %v346_v57 }
 0x279   :  { %v354_v62 = vmul.f32 1.442695, %v347_v58 }
 0x27a   :  { %472 = vpow2.f32 %v348_v59 }
 0x27b   :  { %474 = vpow2.f32 %v350_v60 }
 0x27c   :  { %476 = vpow2.f32 %v352_v61 }
 0x27d   :  { %478 = vpow2.f32 %v354_v62 }
 0x287   :  { %v473_v63 = vpop.eup %472 }
 0x288   :  { %v475_v0 = vpop.eup %474 }
 0x289   :  { %v356_v1 = vadd.f32 %v475_v0, %v473_v63  ;;  %v477_v2 = vpop.eup %476 }
 0x28a   :  { %v479_v4 = vpop.eup %478 }
 0x28b   :  { %v357_v3 = vadd.f32 %v477_v2, %v356_v1 }
 0x28d   :  { %v358_v5 = vadd.f32 %v479_v4, %v357_v3 }
 0x28f   :  { %v359_v6 = vrot.slane %v358_v5, 4 }
 0x291   :  { %v360_v7 = vadd.f32 %v359_v6, %v358_v5 }
 0x293   :  { %v361_v8 = vrot.slane %v360_v7, 2 }
 0x295   :  { %v362_v9 = vadd.f32 %v361_v8, %v360_v7 }
 0x297   :  { %v363_v10 = vrot.slane %v362_v9, 1 }
 0x299   :  { %v364_v11 = vadd.f32 %v363_v10, %v362_v9 }
 0x29b   :  { %480 = vrcp.f32 %v364_v11 }
 0x2a8   :  { %v481_v12 = vpop.eup %480 }
 0x2a9   :  { %v367_v13 = vmul.f32 %v481_v12, %v473_v63  ;;  %v368_v14 = vmul.f32 %v481_v12, %v475_v0  ;;  %v369_v15 = vmul.f32 %v481_v12, %v477_v2  ;;  %v370_v16 = vmul.f32 %v481_v12, %v479_v4 }
 0x2ab   :  { %375 = vst [vmem:[#allocation4] sm:$0xff] %v367_v13  ;;  %376 = vst [vmem:[#allocation4 + $0x8] sm:$0xff] %v368_v14 }
 0x2ac   :  { %377 = vst [vmem:[#allocation4 + $0x10] sm:$0xff] %v369_v15  ;;  %378 = vst [vmem:[#allocation4 + $0x18] sm:$0xff] %v370_v16 }
 0x2ad   :  { %513 = shalt.err (!%p510_p9)
}
 0x2ae   :  { %402 = dma.vmem_to_hbm [thread:$0]  %s397_s19, 512, %s687_s9, [#allocation5], %s530_s16, %s530_s16, %s531_s17  }
 0x2af   :  { %522 = dma.done.wait [#allocation3], 512  }
 0x2b0   :  { %523 = vsyncadd [#allocation3], 4294966784 }
 0x2b1   :  { %524 = dma.done.wait [#allocation5], 512  }
 0x2b2   :  { %525 = vsyncadd [#allocation5], 4294966784 }
 0x2b3   :  { %409 = vsyncpa [#allocation3], 1 }
 0x2b4   :  { %410 = vsyncpa [#allocation5], 1 }

</bundles_post_ra>
